<compile_context>
chip_gen: v5e
topology: v5e:2x2
jax: 0.10.0
libtpu: 0.0.40
codegen_flags: <defaults>
</compile_context>

<pallas_src>
import functools

import jax
import jax.numpy as jnp
from jax.experimental import pallas as pl
from jax.experimental.pallas import tpu as pltpu

LN_EPS = 1e-5
LANE = 128
SUBLANE = 8
NEG_LARGE = -1e30          # finite "-inf" so the online softmax never sees inf - inf
VMEM_FALLBACK = 64 << 20   # assume the smallest (v7x per-TC) VMEM if query fails


# --------------------------------------------------------------------------- #
# sizing helpers
# --------------------------------------------------------------------------- #
def _round_up(n, m):
    return ((n + m - 1) // m) * m


def _padded_bytes(rows, cols):
    """f32 VMEM footprint of a (rows, cols) block after (8,128) tile padding."""
    return _round_up(rows, SUBLANE) * _round_up(cols, LANE) * 4


def _param_bytes(weights):
    return sum(_padded_bytes(*w.shape) for w in weights)


def _vmem_budget():
    """~90% of physical VMEM (device-aware); conservative fallback if unknown."""
    try:
        cap = int(pltpu.get_tpu_info().vmem_capacity_bytes)
    except Exception:
        cap = VMEM_FALLBACK
    return int(cap * 0.9)


def _vmem_limit(need, budget):
    return int(min(budget, max(need, 32 << 20)))


def _pick_lanes(hw, c, tile_bytes_budget, target_lanes):
    """Multiple-of-128 lane tile <= min(floor128(hw), target, bytes budget)."""
    c_pad = _round_up(c, SUBLANE)
    by_budget = (tile_bytes_budget // (c_pad * 4)) // LANE * LANE
    hw_floor = max(LANE, (hw // LANE) * LANE)      # never exceed the array extent
    lanes = min(hw_floor, target_lanes, max(LANE, by_budget))
    return max(LANE, (lanes // LANE) * LANE)


# --------------------------------------------------------------------------- #
# shared in-kernel math
# --------------------------------------------------------------------------- #
def _channel_add_mlp(ctx, w1, b1, gamma, beta, w2, b2):
    """context (C,1) -> 1x1 conv -> LayerNorm([P,1,1]) -> ReLU -> 1x1 conv -> (C,1)."""
    h = jnp.dot(w1, ctx, preferred_element_type=jnp.float32) + b1             # (P, 1)
    mu = jnp.mean(h, axis=0, keepdims=True)
    var = jnp.mean((h - mu) ** 2, axis=0, keepdims=True)
    hn = (h - mu) * jax.lax.rsqrt(var + LN_EPS) * gamma + beta
    a = jnp.maximum(hn, 0.0)                                                  # ReLU
    return jnp.dot(w2, a, preferred_element_type=jnp.float32) + b2            # (C, 1)


# --------------------------------------------------------------------------- #
# kernels
# --------------------------------------------------------------------------- #
def _single_pass_kernel(x_ref, wm_ref, bm_ref, w1_ref, b1_ref,
                        g_ref, be_ref, w2_ref, b2_ref, o_ref):
    """One (C, HW) slab per batch element: pool + MLP + broadcast add (1R + 1W)."""
    x = x_ref[...]                                                            # (C, HW)
    # conv_mask (1x1 conv C->1): (1,C) @ (C,HW)
    logits = jnp.dot(wm_ref[...], x, preferred_element_type=jnp.float32) + bm_ref[...]
    m = jnp.max(logits, axis=-1, keepdims=True)
    p = jnp.exp(logits - m)                                                   # (1, HW)
    s = jnp.sum(p, axis=-1, keepdims=True)                                    # (1, 1)
    # VPU multiply + XLU lane reduce: no transposed copy of the big x slab.
    ctx = jnp.sum(x * p, axis=-1, keepdims=True) / s                          # (C, 1)
    add = _channel_add_mlp(ctx, w1_ref[...], b1_ref[...], g_ref[...],
                           be_ref[...], w2_ref[...], b2_ref[...])             # (C, 1)
    o_ref[...] = x + add                                                      # lane broadcast


def _pool_mlp_kernel(hw_valid, t_lanes, needs_mask,
                     x_ref, wm_ref, bm_ref, w1_ref, b1_ref,
                     g_ref, be_ref, w2_ref, b2_ref, add_ref,
                     m_acc, s_acc, ctx_acc):
    """Tiled pass 1: online-softmax attention pooling + channel_add MLP."""
    t = pl.program_id(1)

    @pl.when(t == 0)
    def _():
        m_acc[...] = jnp.full_like(m_acc, NEG_LARGE)
        s_acc[...] = jnp.zeros_like(s_acc)
        ctx_acc[...] = jnp.zeros_like(ctx_acc)

    x = x_ref[...]                                                            # (C, T)
    if needs_mask:  # static Python bool: HW % T != 0 -> ragged last tile
        pos = t * t_lanes + jax.lax.broadcasted_iota(jnp.int32, (1, t_lanes), 1)
        valid = pos < hw_valid
        x = jnp.where(valid, x, 0.0)                # scrub OOB garbage lanes
    logits = jnp.dot(wm_ref[...], x, preferred_element_type=jnp.float32) + bm_ref[...]
    if needs_mask:
        logits = jnp.where(valid, logits, NEG_LARGE)

    m_old = m_acc[...]                                                        # (1, 1)
    m_new = jnp.maximum(m_old, jnp.max(logits, axis=-1, keepdims=True))
    alpha = jnp.exp(m_old - m_new)
    p = jnp.exp(logits - m_new)                                               # (1, T)
    s_acc[...] = alpha * s_acc[...] + jnp.sum(p, axis=-1, keepdims=True)
    ctx_acc[...] = alpha * ctx_acc[...] + jnp.sum(x * p, axis=-1, keepdims=True)
    m_acc[...] = m_new

    @pl.when(t == pl.num_programs(1) - 1)
    def _():
        ctx = ctx_acc[...] / s_acc[...]                                       # deferred norm
        add_ref[...] = _channel_add_mlp(ctx, w1_ref[...], b1_ref[...], g_ref[...],
                                        be_ref[...], w2_ref[...], b2_ref[...])


def _broadcast_add_kernel(x_ref, add_ref, o_ref):
    """Tiled pass 2: out = x + add_term (broadcast over HW lanes)."""
    o_ref[...] = x_ref[...] + add_ref[...]


# --------------------------------------------------------------------------- #
# wrapper
# --------------------------------------------------------------------------- #
def context_block_forward(x_nchw, params, *, force_two_pass=False, tile_lanes=None):
    """x_nchw: (B, C, H, W) float32.  params: dict from init_params."""
    B, C, H, W = x_nchw.shape
    HW = H * W
    P = params["w1"].shape[0]
    x_flat = x_nchw.reshape(B, C, HW)          # merges contiguous (H, W): no copy

    weights = (params["wm"], params["bm"], params["w1"], params["b1"],
               params["gamma"], params["beta"], params["w2"], params["b2"])
    pbytes = _param_bytes(weights)
    budget = _vmem_budget()
    slab_bytes = _padded_bytes(C, HW)
    headroom = 2 << 20

    # Fused 1R+1W single pass whenever 2 double-buffered (C,HW) slabs + weights fit.
    single_ok = (4 * slab_bytes + 2 * pbytes + headroom) <= budget
    if HW < 2 * LANE:
        use_single = True
    elif force_two_pass:
        use_single = False
    else:
        use_single = single_ok

    if use_single:
        # ---------------- fused single-pass (x read exactly once) -----------------
        wspec = lambda shape: pl.BlockSpec(shape, lambda b: (0,) * len(shape))
        cost = pl.CostEstimate(
            flops=int(B * (5 * C * HW + 4 * C * P + 6 * P)),
            transcendentals=int(B * HW),
            bytes_accessed=int(2 * B * C * HW * 4 + pbytes))
        vmem = _vmem_limit(4 * slab_bytes + 2 * pbytes + headroom, budget)
        out_flat = pl.pallas_call(
            _single_pass_kernel,
            out_shape=jax.ShapeDtypeStruct((B, C, HW), jnp.float32),
            grid=(B,),
            in_specs=[pl.BlockSpec((None, C, HW), lambda b: (b, 0, 0))]
                     + [wspec(w.shape) for w in weights],
            out_specs=pl.BlockSpec((None, C, HW), lambda b: (b, 0, 0)),
            cost_estimate=cost,
            compiler_params=pltpu.CompilerParams(
                dimension_semantics=("parallel",),
                vmem_limit_bytes=vmem),
        )(x_flat, *weights)
    else:
        # ---------------- HW-tiled two-pass ---------------------------------------
        wspec2 = lambda shape: pl.BlockSpec(shape, lambda b, t: (0,) * len(shape))

        # pass 1: online-softmax pooling + MLP -> (B, C, 1)
        t1_budget = max(_padded_bytes(C, LANE),
                        (budget - 2 * pbytes - (4 << 20)) // 2)
        T1 = tile_lanes if tile_lanes is not None else _pick_lanes(HW, C, t1_budget, 1024)
        nt1 = pl.cdiv(HW, T1)
        mask1 = (HW % T1) != 0
        cost1 = pl.CostEstimate(
            flops=int(B * (4 * C * HW + 4 * C * P + 6 * P)),
            transcendentals=int(B * HW),
            bytes_accessed=int(B * C * HW * 4 + pbytes + B * C * 4))
        vmem1 = _vmem_limit(2 * _padded_bytes(C, T1) + 2 * pbytes
                            + 4 * _padded_bytes(C, 1) + (2 << 20), budget)
        add_term = pl.pallas_call(
            functools.partial(_pool_mlp_kernel, HW, T1, mask1),
            out_shape=jax.ShapeDtypeStruct((B, C, 1), jnp.float32),
            grid=(B, nt1),
            in_specs=[pl.BlockSpec((None, C, T1), lambda b, t: (b, 0, t))]
                     + [wspec2(w.shape) for w in weights],
            out_specs=pl.BlockSpec((None, C, 1), lambda b, t: (b, 0, 0)),
            scratch_shapes=[pltpu.VMEM((1, 1), jnp.float32),    # running max
                            pltpu.VMEM((1, 1), jnp.float32),    # running sum
                            pltpu.VMEM((C, 1), jnp.float32)],   # running raw context
            cost_estimate=cost1,
            compiler_params=pltpu.CompilerParams(
                dimension_semantics=("parallel", "arbitrary"),
                vmem_limit_bytes=vmem1),
        )(x_flat, *weights)

        # pass 2: streaming broadcast add, no scratch -> bigger tiles, both axes parallel
        t2_budget = min(8 << 20, max(_padded_bytes(C, LANE), (budget - (2 << 20)) // 4))
        T2 = tile_lanes if tile_lanes is not None else _pick_lanes(HW, C, t2_budget, 8192)
        nt2 = pl.cdiv(HW, T2)
        cost2 = pl.CostEstimate(
            flops=int(B * C * HW),
            transcendentals=0,
            bytes_accessed=int(2 * B * C * HW * 4 + B * C * 4))
        vmem2 = _vmem_limit(4 * _padded_bytes(C, T2) + 4 * _padded_bytes(C, 1)
                            + (2 << 20), budget)
        out_flat = pl.pallas_call(
            _broadcast_add_kernel,
            out_shape=jax.ShapeDtypeStruct((B, C, HW), jnp.float32),
            grid=(B, nt2),
            in_specs=[pl.BlockSpec((None, C, T2), lambda b, t: (b, 0, t)),
                      pl.BlockSpec((None, C, 1), lambda b, t: (b, 0, 0))],
            out_specs=pl.BlockSpec((None, C, T2), lambda b, t: (b, 0, t)),
            cost_estimate=cost2,
            compiler_params=pltpu.CompilerParams(
                dimension_semantics=("parallel", "parallel"),
                vmem_limit_bytes=vmem2),
        )(x_flat, add_term)

    return out_flat.reshape(B, C, H, W)        # splits the contiguous last dim: no copy


# --------------------------------------------------------------------------- #
# params + pure-JAX reference (mirrors the PyTorch forward: 'att' + 'channel_add')
# --------------------------------------------------------------------------- #
def init_params(key, in_channels, ratio):
    planes = int(in_channels * ratio)
    ks = jax.random.split(key, 6)
    return {
        # conv_mask: Conv2d(C, 1, 1)
        "wm": jax.random.normal(ks[0], (1, in_channels), jnp.float32) * 0.1,
        "bm": jax.random.normal(ks[1], (1, 1), jnp.float32) * 0.1,
        # channel_add_conv[0]: Conv2d(C, planes, 1)
        "w1": jax.random.normal(ks[2], (planes, in_channels), jnp.float32) * 0.1,
        "b1": jax.random.normal(ks[3], (planes, 1), jnp.float32) * 0.1,
        # LayerNorm([planes, 1, 1])
        "gamma": jnp.ones((planes, 1), jnp.float32),
        "beta": jnp.zeros((planes, 1), jnp.float32),
        # channel_add_conv[3]: Conv2d(planes, C, 1)
        "w2": jax.random.normal(ks[4], (in_channels, planes), jnp.float32) * 0.1,
        "b2": jax.random.normal(ks[5], (in_channels, 1), jnp.float32) * 0.1,
    }


def reference_forward(x, p):
    B, C, H, W = x.shape
    xf = x.reshape(B, C, H * W)
    logits = jnp.einsum("oc,bcs->bos", p["wm"], xf) + p["bm"][None]        # (B,1,HW)
    attn = jax.nn.softmax(logits, axis=-1)
    context = jnp.einsum("bcs,bos->bco", xf, attn)                         # (B,C,1)
    h = jnp.einsum("pc,bco->bpo", p["w1"], context) + p["b1"][None]        # (B,P,1)
    mu = jnp.mean(h, axis=1, keepdims=True)
    var = jnp.mean((h - mu) ** 2, axis=1, keepdims=True)
    hn = (h - mu) / jnp.sqrt(var + LN_EPS) * p["gamma"][None] + p["beta"][None]
    a = jnp.maximum(hn, 0.0)
    add = jnp.einsum("cp,bpo->bco", p["w2"], a) + p["b2"][None]            # (B,C,1)
    return x + add.reshape(B, C, 1, 1)


# --------------------------------------------------------------------------- #
if __name__ == "__main__":
    key = jax.random.PRNGKey(0)
    fwd = jax.jit(context_block_forward,
                  static_argnames=("force_two_pass", "tile_lanes"))

    # Config 1: B=2, C=4, 16x16 (HW=256) -> fused single-pass kernel.
    B, C, H, W = 2, 4, 16, 16
    kx, kp, key = jax.random.split(key, 3)
    x = jax.random.normal(kx, (B, C, H, W), jnp.float32)
    params = init_params(kp, C, 0.5)                        # planes = 2
    ref = reference_forward(x, params)
    out = jax.block_until_ready(fwd(x, params))
    assert out.shape == (B, C, H, W)
    assert jnp.allclose(out, ref, atol=1e-5, rtol=1e-5), "single-pass mismatch"

    # Config 2: same input, forced onto the two-pass online-softmax path with
    # 128-lane tiles (2 evenly dividing HW tiles).
    out_t = jax.block_until_ready(fwd(x, params, force_two_pass=True, tile_lanes=128))
    assert jnp.allclose(out_t, ref, atol=1e-5, rtol=1e-5), "tiled mismatch"

    # Config 3: non-lane-aligned spatial size (7x7 -> HW=49), single-pass with
    # ragged (masked) stores and no padding copies.
    B2, C2, H2, W2 = 2, 8, 7, 7
    kx2, kp2, key = jax.random.split(key, 3)
    x2 = jax.random.normal(kx2, (B2, C2, H2, W2), jnp.float32)
    params2 = init_params(kp2, C2, 0.25)                    # planes = 2
    ref2 = reference_forward(x2, params2)
    out2 = jax.block_until_ready(fwd(x2, params2))
    assert jnp.allclose(out2, ref2, atol=1e-5, rtol=1e-5), "ragged single-pass mismatch"

    # Config 4: 20x20 (HW=400) forced two-pass with 128-lane tiles -> 4 HW tiles
    # with a ragged last tile (16 valid lanes): exercises the in-kernel masking
    # and the OOB-write masking of the streaming add.
    B3, C3, H3, W3 = 1, 8, 20, 20
    kx3, kp3, key = jax.random.split(key, 3)
    x3 = jax.random.normal(kx3, (B3, C3, H3, W3), jnp.float32)
    params3 = init_params(kp3, C3, 0.25)                    # planes = 2
    ref3 = reference_forward(x3, params3)
    out3 = jax.block_until_ready(fwd(x3, params3, force_two_pass=True, tile_lanes=128))
    assert jnp.allclose(out3, ref3, atol=1e-5, rtol=1e-5), "ragged tiled mismatch"

    print("KERNEL_OK")
</pallas_src>

<mosaic_0001>
module attributes {stable_mosaic.version = 11 : i64} {
  func.func @_single_pass_kernel(%arg0: i32, %arg1: memref<1x4x256xf32, #tpu.memory_space<vmem>>, %arg2: memref<1x4xf32, #tpu.memory_space<vmem>>, %arg3: memref<1x1xf32, #tpu.memory_space<vmem>>, %arg4: memref<2x4xf32, #tpu.memory_space<vmem>>, %arg5: memref<2x1xf32, #tpu.memory_space<vmem>>, %arg6: memref<2x1xf32, #tpu.memory_space<vmem>>, %arg7: memref<2x1xf32, #tpu.memory_space<vmem>>, %arg8: memref<4x2xf32, #tpu.memory_space<vmem>>, %arg9: memref<4x1xf32, #tpu.memory_space<vmem>>, %arg10: memref<1x4x256xf32, #tpu.memory_space<vmem>>) attributes {dimension_semantics = [#tpu.dimension_semantics<parallel>], iteration_bounds = array<i64: 2>, scalar_prefetch = 0 : i64, scratch_operands = 0 : i64, tpu.core_type = #tpu.core_type<tc>, window_params = [{transform_indices = @transform_0, window_bounds = array<i64: 1, 4, 256>}, {pipeline_mode = #tpu.pipeline_mode<synchronous>, transform_indices = @transform_1, window_bounds = array<i64: 1, 4>}, {pipeline_mode = #tpu.pipeline_mode<synchronous>, transform_indices = @transform_2, window_bounds = array<i64: 1, 1>}, {pipeline_mode = #tpu.pipeline_mode<synchronous>, transform_indices = @transform_3, window_bounds = array<i64: 2, 4>}, {pipeline_mode = #tpu.pipeline_mode<synchronous>, transform_indices = @transform_4, window_bounds = array<i64: 2, 1>}, {pipeline_mode = #tpu.pipeline_mode<synchronous>, transform_indices = @transform_5, window_bounds = array<i64: 2, 1>}, {pipeline_mode = #tpu.pipeline_mode<synchronous>, transform_indices = @transform_6, window_bounds = array<i64: 2, 1>}, {pipeline_mode = #tpu.pipeline_mode<synchronous>, transform_indices = @transform_7, window_bounds = array<i64: 4, 2>}, {pipeline_mode = #tpu.pipeline_mode<synchronous>, transform_indices = @transform_8, window_bounds = array<i64: 4, 1>}, {transform_indices = @transform_9, window_bounds = array<i64: 1, 4, 256>}]} {
    %c0 = arith.constant 0 : index
    %c0_0 = arith.constant 0 : index
    %c0_1 = arith.constant 0 : index
    %0 = vector.load %arg1[%c0, %c0_0, %c0_1] : memref<1x4x256xf32, #tpu.memory_space<vmem>>, vector<1x4x256xf32>
    %1 = vector.shape_cast %0 : vector<1x4x256xf32> to vector<4x256xf32>
    %c0_2 = arith.constant 0 : index
    %c0_3 = arith.constant 0 : index
    %2 = vector.load %arg2[%c0_2, %c0_3] : memref<1x4xf32, #tpu.memory_space<vmem>>, vector<1x4xf32>
    %cst = arith.constant dense<0.000000e+00> : vector<1x256xf32>
    %3 = tpu.matmul %2, %1, %cst {dimension_numbers = #tpu.dot_dimension_numbers<[1], [0], [0], [1], [0, 0, 1, 1], [], []>} : vector<1x4xf32>, vector<4x256xf32>, vector<1x256xf32> -> vector<1x256xf32>
    %c0_4 = arith.constant 0 : index
    %c0_5 = arith.constant 0 : index
    %4 = vector.load %arg3[%c0_4, %c0_5] : memref<1x1xf32, #tpu.memory_space<vmem>>, vector<1x1xf32>
    %5 = vector.broadcast %4 : vector<1x1xf32> to vector<1x256xf32>
    %6 = arith.addf %3, %5 : vector<1x256xf32>
    %cst_6 = arith.constant dense<0xFF800000> : vector<1xf32>
    %7 = vector.multi_reduction <maximumf>, %6, %cst_6 [1] : vector<1x256xf32> to vector<1xf32>
    %8 = vector.shape_cast %7 : vector<1xf32> to vector<1x1xf32>
    %9 = vector.broadcast %8 : vector<1x1xf32> to vector<1x256xf32>
    %10 = arith.subf %6, %9 : vector<1x256xf32>
    %11 = math.exp %10 : vector<1x256xf32>
    %cst_7 = arith.constant dense<0.000000e+00> : vector<1xf32>
    %12 = vector.multi_reduction <add>, %11, %cst_7 [1] : vector<1x256xf32> to vector<1xf32>
    %13 = vector.shape_cast %12 : vector<1xf32> to vector<1x1xf32>
    %14 = vector.broadcast %11 : vector<1x256xf32> to vector<4x256xf32>
    %15 = arith.mulf %1, %14 : vector<4x256xf32>
    %cst_8 = arith.constant dense<0.000000e+00> : vector<4xf32>
    %16 = vector.multi_reduction <add>, %15, %cst_8 [1] : vector<4x256xf32> to vector<4xf32>
    %17 = vector.shape_cast %16 : vector<4xf32> to vector<4x1xf32>
    %18 = vector.broadcast %13 : vector<1x1xf32> to vector<4x1xf32>
    %19 = arith.divf %17, %18 : vector<4x1xf32>
    %c0_9 = arith.constant 0 : index
    %c0_10 = arith.constant 0 : index
    %20 = vector.load %arg4[%c0_9, %c0_10] : memref<2x4xf32, #tpu.memory_space<vmem>>, vector<2x4xf32>
    %c0_11 = arith.constant 0 : index
    %c0_12 = arith.constant 0 : index
    %21 = vector.load %arg5[%c0_11, %c0_12] : memref<2x1xf32, #tpu.memory_space<vmem>>, vector<2x1xf32>
    %c0_13 = arith.constant 0 : index
    %c0_14 = arith.constant 0 : index
    %22 = vector.load %arg6[%c0_13, %c0_14] : memref<2x1xf32, #tpu.memory_space<vmem>>, vector<2x1xf32>
    %c0_15 = arith.constant 0 : index
    %c0_16 = arith.constant 0 : index
    %23 = vector.load %arg7[%c0_15, %c0_16] : memref<2x1xf32, #tpu.memory_space<vmem>>, vector<2x1xf32>
    %c0_17 = arith.constant 0 : index
    %c0_18 = arith.constant 0 : index
    %24 = vector.load %arg8[%c0_17, %c0_18] : memref<4x2xf32, #tpu.memory_space<vmem>>, vector<4x2xf32>
    %c0_19 = arith.constant 0 : index
    %c0_20 = arith.constant 0 : index
    %25 = vector.load %arg9[%c0_19, %c0_20] : memref<4x1xf32, #tpu.memory_space<vmem>>, vector<4x1xf32>
    %cst_21 = arith.constant dense<0.000000e+00> : vector<2x1xf32>
    %26 = tpu.matmul %20, %19, %cst_21 {dimension_numbers = #tpu.dot_dimension_numbers<[1], [0], [0], [1], [0, 0, 1, 1], [], []>} : vector<2x4xf32>, vector<4x1xf32>, vector<2x1xf32> -> vector<2x1xf32>
    %27 = arith.addf %26, %21 : vector<2x1xf32>
    %cst_22 = arith.constant dense<0.000000e+00> : vector<1xf32>
    %28 = vector.multi_reduction <add>, %27, %cst_22 [0] : vector<2x1xf32> to vector<1xf32>
    %29 = vector.shape_cast %28 : vector<1xf32> to vector<1x1xf32>
    %cst_23 = arith.constant 2.000000e+00 : f32
    %30 = vector.broadcast %cst_23 : f32 to vector<1x1xf32>
    %31 = arith.divf %29, %30 : vector<1x1xf32>
    %32 = vector.broadcast %31 : vector<1x1xf32> to vector<2x1xf32>
    %33 = arith.subf %27, %32 : vector<2x1xf32>
    %34 = arith.mulf %33, %33 : vector<2x1xf32>
    %cst_24 = arith.constant dense<0.000000e+00> : vector<1xf32>
    %35 = vector.multi_reduction <add>, %34, %cst_24 [0] : vector<2x1xf32> to vector<1xf32>
    %36 = vector.shape_cast %35 : vector<1xf32> to vector<1x1xf32>
    %cst_25 = arith.constant 2.000000e+00 : f32
    %37 = vector.broadcast %cst_25 : f32 to vector<1x1xf32>
    %38 = arith.divf %36, %37 : vector<1x1xf32>
    %39 = vector.broadcast %31 : vector<1x1xf32> to vector<2x1xf32>
    %40 = arith.subf %27, %39 : vector<2x1xf32>
    %cst_26 = arith.constant 9.99999974E-6 : f32
    %41 = vector.broadcast %cst_26 : f32 to vector<1x1xf32>
    %42 = arith.addf %38, %41 : vector<1x1xf32>
    %43 = math.rsqrt %42 : vector<1x1xf32>
    %44 = vector.broadcast %43 : vector<1x1xf32> to vector<2x1xf32>
    %45 = arith.mulf %40, %44 : vector<2x1xf32>
    %46 = arith.mulf %45, %22 : vector<2x1xf32>
    %47 = arith.addf %46, %23 : vector<2x1xf32>
    %cst_27 = arith.constant 0.000000e+00 : f32
    %48 = vector.broadcast %cst_27 : f32 to vector<2x1xf32>
    %49 = arith.maximumf %47, %48 : vector<2x1xf32>
    %cst_28 = arith.constant dense<0.000000e+00> : vector<4x1xf32>
    %50 = tpu.matmul %24, %49, %cst_28 {dimension_numbers = #tpu.dot_dimension_numbers<[1], [0], [0], [1], [0, 0, 1, 1], [], []>} : vector<4x2xf32>, vector<2x1xf32>, vector<4x1xf32> -> vector<4x1xf32>
    %51 = arith.addf %50, %25 : vector<4x1xf32>
    %52 = vector.broadcast %51 : vector<4x1xf32> to vector<4x256xf32>
    %53 = arith.addf %1, %52 : vector<4x256xf32>
    %c0_29 = arith.constant 0 : index
    %c0_30 = arith.constant 0 : index
    %c0_31 = arith.constant 0 : index
    %54 = vector.load %arg10[%c0_29, %c0_30, %c0_31] : memref<1x4x256xf32, #tpu.memory_space<vmem>>, vector<1x4x256xf32>
    %55 = vector.shape_cast %54 : vector<1x4x256xf32> to vector<4x256xf32>
    %56 = vector.shape_cast %53 : vector<4x256xf32> to vector<1x4x256xf32>
    tpu.vector_store %arg10[%c0_29, %c0_30, %c0_31], %56 {strides = array<i32>} : memref<1x4x256xf32, #tpu.memory_space<vmem>>, vector<1x4x256xf32>,
    return
  }
  func.func @transform_0(%arg0: i32) -> (i32, i32, i32) {
    %c0_i32 = arith.constant 0 : i32
    %c0_i32_0 = arith.constant 0 : i32
    %c0_i32_1 = arith.constant 0 : i32
    return %arg0, %c0_i32, %c0_i32_0 : i32, i32, i32
  }
  func.func @transform_1(%arg0: i32) -> (i32, i32) {
    %c0_i32 = arith.constant 0 : i32
    %c0_i32_0 = arith.constant 0 : i32
    %c0_i32_1 = arith.constant 0 : i32
    return %c0_i32, %c0_i32_0 : i32, i32
  }
  func.func @transform_2(%arg0: i32) -> (i32, i32) {
    %c0_i32 = arith.constant 0 : i32
    %c0_i32_0 = arith.constant 0 : i32
    %c0_i32_1 = arith.constant 0 : i32
    return %c0_i32, %c0_i32_0 : i32, i32
  }
  func.func @transform_3(%arg0: i32) -> (i32, i32) {
    %c0_i32 = arith.constant 0 : i32
    %c0_i32_0 = arith.constant 0 : i32
    %c0_i32_1 = arith.constant 0 : i32
    return %c0_i32, %c0_i32_0 : i32, i32
  }
  func.func @transform_4(%arg0: i32) -> (i32, i32) {
    %c0_i32 = arith.constant 0 : i32
    %c0_i32_0 = arith.constant 0 : i32
    %c0_i32_1 = arith.constant 0 : i32
    return %c0_i32, %c0_i32_0 : i32, i32
  }
  func.func @transform_5(%arg0: i32) -> (i32, i32) {
    %c0_i32 = arith.constant 0 : i32
    %c0_i32_0 = arith.constant 0 : i32
    %c0_i32_1 = arith.constant 0 : i32
    return %c0_i32, %c0_i32_0 : i32, i32
  }
  func.func @transform_6(%arg0: i32) -> (i32, i32) {
    %c0_i32 = arith.constant 0 : i32
    %c0_i32_0 = arith.constant 0 : i32
    %c0_i32_1 = arith.constant 0 : i32
    return %c0_i32, %c0_i32_0 : i32, i32
  }
  func.func @transform_7(%arg0: i32) -> (i32, i32) {
    %c0_i32 = arith.constant 0 : i32
    %c0_i32_0 = arith.constant 0 : i32
    %c0_i32_1 = arith.constant 0 : i32
    return %c0_i32, %c0_i32_0 : i32, i32
  }
  func.func @transform_8(%arg0: i32) -> (i32, i32) {
    %c0_i32 = arith.constant 0 : i32
    %c0_i32_0 = arith.constant 0 : i32
    %c0_i32_1 = arith.constant 0 : i32
    return %c0_i32, %c0_i32_0 : i32, i32
  }
  func.func @transform_9(%arg0: i32) -> (i32, i32, i32) {
    %c0_i32 = arith.constant 0 : i32
    %c0_i32_0 = arith.constant 0 : i32
    %c0_i32_1 = arith.constant 0 : i32
    return %arg0, %c0_i32, %c0_i32_0 : i32, i32, i32
  }
}

</mosaic_0001>

<bundles_post_ra>
// kernel: context_block_forward.1
= control target key start
LH: loop header
LB: loop body
LE: loop exit
PB: predicated region body
PF: predicated region fallthrough
CT: control target
= control target key end

     0   :  { %s724_s11 = smov 0   ;;  %s789_s0 = inlined_call_operand.vmem [shape: f32[2,4,256], index: 0, kind: input, shape index: {}]   ;;  %s790_s1 = inlined_call_operand.vmem [shape: f32[1,4], index: 1, kind: input, shape index: {}]   ;;  %s791_s2 = inlined_call_operand.<no memory space> [shape: f32[1,1], index: 2, kind: input, shape index: {}]   ;;  %s792_s3 = inlined_call_operand.vmem [shape: f32[2,4], index: 3, kind: input, shape index: {}]   ;;  %s793_s4 = inlined_call_operand.vmem [shape: f32[2,1], index: 4, kind: input, shape index: {}]   ;;  %s794_s5 = inlined_call_operand.vmem [shape: f32[2,1], index: 5, kind: input, shape index: {}]   ;;  %s795_s6 = inlined_call_operand.vmem [shape: f32[2,1], index: 6, kind: input, shape index: {}]   ;;  %s796_s7 = inlined_call_operand.vmem [shape: f32[4,2], index: 7, kind: input, shape index: {}]   ;;  %s797_s8 = inlined_call_operand.vmem [shape: f32[4,1], index: 8, kind: input, shape index: {}]   ;;  %s798_s9 = inlined_call_operand.vmem [shape: f32[2,4,256], index: 9, kind: output, shape index: {}]  }
   0x1   :  { %v14_v0 = vstv %s791_s2 }
   0x2   :  { %15 = vst [vmem:[#allocation2] sm:$0x1] %v14_v0 }
   0x3 LB: > { %s616_s12 = sadd.s32 4294967295, %s666_s11   ;;  %p620_p0 = scmp.ge.s32.totalorder %s666_s11, 1  ;;  %s666_s11 = sphi %s724_s11, %s21_s11  }
   0x4   : > { %p289_p1 = scmp.lt.s32.totalorder %s666_s11, 3 }
   0x6   : > { %p290_p2 = pnand %p620_p0, %p289_p1 }
   0x7   : > { %p325_p3 = scmp.lt.s32.totalorder (!%p290_p2), %s616_s12, 1 }
   0x8   : > { %293 = sbr.rel (%p290_p2) target bundleno = 853 (0x355), region = 56 }
   0xd   : > { %v668_v1 = vmov 0   ;;  %v337_v2 = vld [vmem:[#allocation2] sm:$0x1]  ;;  %s800_s12 = smov (!%p325_p3, %s616_s12), 1  ;;  %vm352_vm0 = vcmask 1043456   ;;  %vm348_vm1 = vcmask 31744  }
   0xe   : > { %648 = vset.pattern.permute.xlu0 %v668_v1  ;;  %649 = vset.pattern.permute.xlu2 %v668_v1  ;;  %s635_s2 = sshll.u32 %s800_s12, 3  ;;  %v336_v4 = vld [vmem:[%s790_s1] sm:$0x1]  ;;  %vm397_vm2 = vcmask 1040384   ;;  %v669_v51 = vmov 2.0   ;;  %vm481_vm7 = vcmask 1024  }
   0xf   : > { %340 = vperm.xlu0 %648, %v337_v2   ;;  %s329_s15 = scalar_lea.vmem %s789_s0, %s635_s2  ;;  %v449_v50 = vld [vmem:[%s792_s3] sm:$0x3]  ;;  %vm526_vm12 = vcmask 1041408   ;;  %vm522_vm13 = vcmask 15360   ;;  %s334_s13 = scalar_lea.vmem %s798_s9, %s635_s2 }
  0x10   : > { %v740_v3 = vld [vmem:[%s329_s15] sm:$0xff] }
  0x11   : > { %345 = vst [vmem:[#allocation1] ss:$2 sm:$0xff] %v740_v3  ;;  %v450_v54 = vld [vmem:[%s793_s4] sm:$0x3] }
  0x18   : > { %v346_v5 = vld.sshfl [vmem:[#allocation1] sm:$0xff pattern:$0x75316420]  ;;  %v347_v6 = vld.sshfl [vmem:[#allocation1 + $0x8] sm:$0xff pattern:$0x75316420] }
  0x19   : > { %625 = vmatpush.msk.msra.mxu0 %vm352_vm0, %v346_v5  ;;  %627 = vmatpush.msk.msra.mxu1 %vm352_vm0, %v347_v6 }
  0x1a   : > { %626 = vmatmul.msk.f32.vlgmr.msra.gmra.mxu0 %vm348_vm1, %v336_v4  ;;  %628 = vmatmul.msk.f32.vlgmr.msra.gmra.mxu1 %vm348_vm1, %v336_v4 }
  0x81   : > { %v341_v7 = vpop.permute.xlu0 %340 }
  0x82   : > { %v343_v8 = vperm.slane %v341_v7, 0 }
  0x97   : > { %v374_v9 = vpop.f32.mrf.mxu0  ;;  %v394_v10 = vpop.f32.mrf.mxu1 }
  0x98   : > { %v375_v11 = vadd.f32 %v374_v9, %v343_v8  ;;  %v395_v12 = vadd.f32 %v394_v10, %v343_v8 }
  0x9a   : > { %v398_v13 = vsel %vm397_vm2, %v375_v11, -inf  ;;  %v399_v14 = vsel %vm397_vm2, %v395_v12, -inf }
  0x9b   : > { %v400_v15 = vmax.f32 %v398_v13, %v399_v14 }
  0x9d   : > { %401 = vmax.xlane.f32.xlu0 %v400_v15 }
 0x110   : > { %v402_v16 = vpop.xlane.xlu0 %401 }
 0x111   : > { %v403_v17 = vsub.f32 %v375_v11, %v402_v16  ;;  %v404_v18 = vsub.f32 %v395_v12, %v402_v16 }
 0x113   : > { %v405_v19 = vmul.f32 1.442695, %v403_v17  ;;  %v407_v20 = vmul.f32 1.442695, %v404_v18 }
 0x115   : > { %650 = vpow2.f32 %v405_v19 }
 0x116   : > { %652 = vpow2.f32 %v407_v20 }
 0x11b   : > { %v651_v21 = vpop.eup %650 }
 0x11c   : > { %v653_v22 = vpop.eup %652  ;;  %v409_v23 = vsel %vm397_vm2, %v651_v21, 0.0  ;;  %v414_v27 = vperm.slane %v651_v21, 0 }
 0x11d   : > { %v415_v24 = vperm.slane %v653_v22, 0  ;;  %v410_v25 = vsel %vm397_vm2, %v653_v22, 0.0 }
 0x11e   : > { %v411_v26 = vadd.f32 %v410_v25, %v409_v23 }
 0x11f   : > { %v418_v28 = vrot.slane %v415_v24, 4  ;;  %v451_v24 = vld [vmem:[%s794_s5] sm:$0x3] }
 0x120   : > { %412 = vadd.xlane.f32.xlu1 %v411_v26  ;;  %v452_v26 = vld [vmem:[%s795_s6] sm:$0x3] }
 0x121   : > { %v419_v29 = vsel %vm352_vm0, %v414_v27, %v418_v28 }
 0x122   : > { %v421_v30 = vmul.f32 %v419_v29, %v740_v3 }
 0x124   : > { %423 = vst [vmem:[#allocation1] ss:$2 sm:$0xff] %v421_v30  ;;  %v453_v30 = vld [vmem:[%s796_s7] sm:$0xf] }
 0x12b   : > { %v424_v31 = vld.sshfl [vmem:[#allocation1] sm:$0xff pattern:$0x75316420]  ;;  %v425_v32 = vld.sshfl [vmem:[#allocation1 + $0x8] sm:$0xff pattern:$0x75316420] }
 0x12c   : > { %v428_v33 = vsel %vm352_vm0, %v424_v31, 0.0  ;;  %v429_v34 = vsel %vm352_vm0, %v425_v32, 0.0  ;;  %v454_v31 = vld [vmem:[%s797_s8] sm:$0xf] }
 0x12d   : > { %v430_v35 = vadd.f32 %v429_v34, %v428_v33  ;;  %v670_v34 = vmov 839922192  }
 0x12f   : > { %431 = vadd.xlane.f32.xlu1 %v430_v35  ;;  %v555_v35 = vunpack.c.l.s4 %v670_v34 }
 0x193   : > { %v413_v36 = vpop.xlane.xlu1 %412 }
 0x194   : > { %v433_v37 = vperm.slane %v413_v36, 0  ;;  %v556_v36 = vunpack.c.0.s8 %v555_v35 }
 0x196   : > { %654 = vrcp.f32 %v433_v37  ;;  %v445_v41 = vand.u32 2147483648, %v433_v37  ;;  %v443_v43 = vand.u32 2147483647, %v433_v37  ;;  %vm439_vm4 = vweird.f32 %v433_v37 }
 0x197   : > { %656 = vrcp.f32 %v669_v51 }
 0x198   : > { %v446_v45 = vor.u32 1.1754944e-38, %v445_v41  ;;  %vm444_vm6 = vcmp.eq.f32.partialorder %v443_v43, 8.507059e+37 }
 0x19c   : > { %v655_v38 = vpop.eup %654 }
 0x19d   : > { %v435_v39 = vmul.f32 %v655_v38, %v433_v37  ;;  %vm440_vm3 = vweird.f32 %v655_v38  ;;  %v657_v52 = vpop.eup %656 }
 0x19e   : > { %vm441_vm5 = vmor %vm439_vm4, %vm440_vm3  ;;  %v490_v53 = vmul.f32 2.0, %v657_v52  ;;  %vm494_vm8 = vweird.f32 %v657_v52 }
 0x19f   : > { %v436_v40 = vsub.f32 1.0, %v435_v39 }
 0x1a0   : > { %v491_v57 = vsub.f32 1.0, %v490_v53 }
 0x1a1   : > { %v437_v42 = vmul.f32 %v655_v38, %v436_v40 }
 0x1a2   : > { %v432_v48 = vpop.xlane.xlu1 %431  ;;  %v492_v60 = vmul.f32 %v657_v52, %v491_v57 }
 0x1a3   : > { %v438_v44 = vadd.f32 %v655_v38, %v437_v42 }
 0x1a4   : > { %v493_v63 = vadd.f32 %v657_v52, %v492_v60 }
 0x1a5   : > { %v442_v46 = vsel %vm441_vm5, %v655_v38, %v438_v44 }
 0x1a6   : > { %v447_v47 = vsel %vm444_vm6, %v446_v45, %v442_v46  ;;  %v495_v2 = vsel %vm494_vm8, %v657_v52, %v493_v63 }
 0x1a7   : > { %v448_v49 = vmul.f32 %v447_v47, %v432_v48 }
 0x1a9   : > { %629 = vmatpush.msk.msra.mxu2 %vm352_vm0, %v448_v49 }
 0x1aa   : > { %630 = vmatmul.msk.f32.vlgmr.msra.gmra.mxu2 %vm348_vm1, %v449_v50 }
 0x22d   : > { %v478_v55 = vpop.f32.mrf.mxu2 }
 0x22e   : > { %v479_v56 = vadd.f32 %v478_v55, %v450_v54 }
 0x230   : > { %v482_v58 = vsel %vm481_vm7, %v479_v56, 0.0 }
 0x231   : > { %v483_v59 = vrot.slane %v482_v58, 4 }
 0x233   : > { %v484_v61 = vadd.f32 %v483_v59, %v482_v58 }
 0x235   : > { %v485_v62 = vrot.slane %v484_v61, 2 }
 0x237   : > { %v486_v0 = vadd.f32 %v485_v62, %v484_v61 }
 0x239   : > { %v487_v1 = vrot.slane %v486_v0, 1 }
 0x23b   : > { %v488_v4 = vadd.f32 %v487_v1, %v486_v0 }
 0x23d   : > { %v496_v5 = vmul.f32 %v495_v2, %v488_v4 }
 0x23f   : > { %v497_v6 = vsub.f32 %v479_v56, %v496_v5 }
 0x241   : > { %v498_v7 = vmul.f32 %v497_v6, %v497_v6 }
 0x243   : > { %v499_v8 = vsel %vm481_vm7, %v498_v7, 0.0 }
 0x244   : > { %v500_v9 = vrot.slane %v499_v8, 4 }
 0x246   : > { %v501_v10 = vadd.f32 %v500_v9, %v499_v8 }
 0x248   : > { %v502_v11 = vrot.slane %v501_v10, 2 }
 0x24a   : > { %v503_v12 = vadd.f32 %v502_v11, %v501_v10 }
 0x24c   : > { %v504_v13 = vrot.slane %v503_v12, 1 }
 0x24e   : > { %v505_v14 = vadd.f32 %v504_v13, %v503_v12 }
 0x250   : > { %v506_v15 = vmul.f32 %v505_v14, %v495_v2 }
 0x252   : > { %v507_v16 = vadd.f32 1e-05, %v506_v15 }
 0x254   : > { %658 = vrsqrt.f32 %v507_v16  ;;  %vm514_vm10 = vweird.f32 %v507_v16 }
 0x25a   : > { %v659_v17 = vpop.eup %658 }
 0x25b   : > { %v509_v18 = vmul.f32 %v659_v17, %v507_v16  ;;  %vm515_vm9 = vweird.f32 %v659_v17 }
 0x25c   : > { %vm516_vm11 = vmor %vm514_vm10, %vm515_vm9 }
 0x25d   : > { %v510_v19 = vmul.f32 %v659_v17, %v509_v18 }
 0x25f   : > { %v511_v20 = vmul.f32 0.5, %v510_v19 }
 0x261   : > { %v512_v21 = vsub.f32 1.5, %v511_v20 }
 0x263   : > { %v513_v22 = vmul.f32 %v659_v17, %v512_v21 }
 0x265   : > { %v517_v23 = vsel %vm516_vm11, %v659_v17, %v513_v22 }
 0x266   : > { %v518_v25 = vmul.f32 %v517_v23, %v497_v6 }
 0x268   : > { %v519_v27 = vmul.f32 %v518_v25, %v451_v24 }
 0x26a   : > { %v520_v28 = vadd.f32 %v519_v27, %v452_v26 }
 0x26c   : > { %v521_v29 = vmax.f32 %v520_v28, 0.0 }
 0x26e   : > { %631 = vmatpush.msk.msra.mxu3 %vm526_vm12, %v521_v29 }
 0x26f   : > { %632 = vmatmul.msk.f32.vlgmr.msra.gmra.mxu3 %vm522_vm13, %v453_v30 }
 0x2f2   : > { %v547_v32 = vpop.f32.mrf.mxu3 }
 0x2f3   : > { %v548_v33 = vadd.f32 %v547_v32, %v454_v31 }
 0x2f5   : > { %552 = vperm.xlu2 %649, %v548_v33  }
 0x34f   : > { %v553_v37 = vpop.permute.xlu2 %552 }
 0x350   : > { %v557_v38 = vperm.slane %v553_v37, %v556_v36 }
 0x352   : > { %v559_v39 = vadd.f32 %v557_v38, %v740_v3 }
 0x354   : > { %560 = vst [vmem:[%s334_s13] sm:$0xff] %v559_v39 }
 0x355 PF: > { %s21_s11 = sadd.s32 1, %s666_s11  }
 0x356   : > { %p18_p4 = scmp.ge.s32.totalorder %s21_s11, 4  }
 0x358   :  { %20 = sbr.rel (!%p18_p4) target bundleno = 3 (0x3), region = 86 }

</bundles_post_ra>
